<compile_context>
chip_gen: v5e
topology: v5e:2x2
jax: 0.10.0
libtpu: 0.0.40
codegen_flags: <defaults>
</compile_context>

<pallas_src>
import functools

import jax
import jax.numpy as jnp
from jax.experimental import pallas as pl
from jax.experimental.pallas import tpu as pltpu


def _round_up(x, m):
    return ((x + m - 1) // m) * m


def _latent_loss_kernel(mean_ref, lss_ref, pmean_ref, plss_ref, o_ref):
    """Accumulate -0.5 * sum(1 + lss - 2*log(p) - ((m - pm)^2 + exp(lss)) / p^2)."""

    @pl.when(pl.program_id(0) == 0)
    def _():
        o_ref[0, 0] = jnp.float32(0.0)

    # Upcast to f32 in-kernel (v5e has no bf16 VPU/EUP; keeps math exact).
    mean = mean_ref[...].astype(jnp.float32)
    lss = lss_ref[...].astype(jnp.float32)
    pmean = pmean_ref[...].astype(jnp.float32)
    plss = plss_ref[...].astype(jnp.float32)

    sub = mean - pmean
    logp = 2.0 * jnp.log(plss)     # kept only for the "- logp" term
    expp = plss * plss             # == exp(2*log(p)) for p > 0; one fewer EUP op
    inv = pl.reciprocal(expp)      # single shared (exact) reciprocal for both divides
    term = 1.0 + lss - logp - (sub * sub + jnp.exp(lss)) * inv
    o_ref[0, 0] += -0.5 * jnp.sum(term)


def _fused_kl(mean, lss, pmean, plss):
    """One gridded pallas_call computing the full KL sum over a (B, D) slab."""
    b, d = mean.shape
    pad_d = _round_up(d, 128)

    # Tile rows: biggest multiple of 8 such that 4 inputs x 2 pipeline buffers
    # of (tb, pad_d) f32 stay under ~8 MiB (fits default scoped VMEM on
    # v5e/v6e/v7x without raising vmem_limit_bytes).
    budget_bytes = 8 << 20
    per_row_bytes = 4 * 2 * pad_d * 4
    tb = max(8, (budget_bytes // per_row_bytes) // 8 * 8)
    tb = min(tb, _round_up(b, 8))
    pad_b = _round_up(b, tb)

    def pad(x, cval):
        return jnp.pad(
            x, ((0, pad_b - x.shape[0]), (0, pad_d - x.shape[1])),
            constant_values=cval)

    # Neutral padding: term == 1 + 0 - 2*log(1) - (0 + exp(0)) / 1 == 0.
    mean_p = pad(mean, 0)
    lss_p = pad(lss, 0)
    pmean_p = pad(pmean, 0)
    plss_p = pad(plss, 1)

    grid = (pad_b // tb,)
    in_spec = pl.BlockSpec((tb, pad_d), lambda i: (i, 0))

    out = pl.pallas_call(
        _latent_loss_kernel,
        out_shape=jax.ShapeDtypeStruct((1, 1), jnp.float32),
        grid_spec=pltpu.PrefetchScalarGridSpec(
            num_scalar_prefetch=0,
            grid=grid,
            in_specs=[in_spec, in_spec, in_spec, in_spec],
            out_specs=pl.BlockSpec((1, 1), lambda i: (0, 0),
                                   memory_space=pltpu.MemorySpace.SMEM),
        ),
        compiler_params=pltpu.CompilerParams(
            dimension_semantics=("arbitrary",)),  # reduction axis
    )(mean_p, lss_p, pmean_p, plss_p)
    return out[0, 0]


def latent_loss(n_h1, n_h2,
                z_mean, z_log_sigma_sq,
                prior_z_mean=None, prior_z_log_sigma_sq=None,
                h1_mean=None, h2_mean=None,
                h1_log_sigma_sq=None, h2_log_sigma_sq=None,
                prior_h1_mean=None, prior_h2_mean=None,
                prior_h1_log_sigma_sq=None, prior_h2_log_sigma_sq=None):
    """Mirrors Latentloss(n_h1, n_h2).forward(...) from VCCA_pytorch/loss.py."""
    means = [z_mean]
    lsss = [z_log_sigma_sq]
    pmeans = [prior_z_mean]
    plsss = [prior_z_log_sigma_sq]

    if n_h1 > 0:
        if n_h2 <= 0:
            # The PyTorch module would raise UnboundLocalError here.
            raise ValueError("Latentloss: n_h1 > 0 requires n_h2 > 0 "
                             "(the reference module sums z + h1 + h2).")
        means += [h1_mean, h2_mean]
        lsss += [h1_log_sigma_sq, h2_log_sigma_sq]
        pmeans += [prior_h1_mean, prior_h2_mean]
        plsss += [prior_h1_log_sigma_sq, prior_h2_log_sigma_sq]
    # else: like the PyTorch module, any h2 term is computed-but-discarded;
    # we simply skip it (n_h2 > 0 with n_h1 == 0 returns only the z term).

    # Fuse the three groups along the lane dim -> one kernel launch.
    # (For extremely large latents one could instead pass the 12 refs
    #  separately to avoid the concat copy; at VCCA sizes this is negligible.)
    mean = jnp.concatenate(means, axis=1)
    lss = jnp.concatenate(lsss, axis=1)
    pmean = jnp.concatenate(pmeans, axis=1)
    plss = jnp.concatenate(plsss, axis=1)
    return _fused_kl(mean, lss, pmean, plss)


def _kl_term_ref(mean, lss, pmean, plss):
    # Pure-JAX reference using the *original* PyTorch formula.
    sub = mean - pmean
    logp = jnp.log(plss) * 2.0
    expp = jnp.exp(logp)
    return -0.5 * jnp.sum(1.0 + lss - logp - sub ** 2 / expp - jnp.exp(lss) / expp)


if __name__ == "__main__":
    key = jax.random.PRNGKey(0)
    batch, n_z, n_h1, n_h2 = 2, 32, 16, 16

    ks = jax.random.split(key, 12)

    def normal(k, d):
        return jax.random.normal(k, (batch, d), jnp.float32)

    def positive(k, d):
        # prior "log_sigma_sq" is fed to log -> must be strictly positive
        return jnp.abs(jax.random.normal(k, (batch, d), jnp.float32)) + 0.5

    z_mean = normal(ks[0], n_z)
    z_lss = 0.1 * normal(ks[1], n_z)
    pz_mean = normal(ks[2], n_z)
    pz_lss = positive(ks[3], n_z)

    h1_mean = normal(ks[4], n_h1)
    h1_lss = 0.1 * normal(ks[5], n_h1)
    ph1_mean = normal(ks[6], n_h1)
    ph1_lss = positive(ks[7], n_h1)

    h2_mean = normal(ks[8], n_h2)
    h2_lss = 0.1 * normal(ks[9], n_h2)
    ph2_mean = normal(ks[10], n_h2)
    ph2_lss = positive(ks[11], n_h2)

    fn = jax.jit(functools.partial(latent_loss, n_h1, n_h2))
    out = fn(z_mean, z_lss, pz_mean, pz_lss,
             h1_mean=h1_mean, h2_mean=h2_mean,
             h1_log_sigma_sq=h1_lss, h2_log_sigma_sq=h2_lss,
             prior_h1_mean=ph1_mean, prior_h2_mean=ph2_mean,
             prior_h1_log_sigma_sq=ph1_lss, prior_h2_log_sigma_sq=ph2_lss)
    out = jax.block_until_ready(out)

    # pure-JAX reference check (original formula, original branching)
    ref = (_kl_term_ref(z_mean, z_lss, pz_mean, pz_lss)
           + _kl_term_ref(h1_mean, h1_lss, ph1_mean, ph1_lss)
           + _kl_term_ref(h2_mean, h2_lss, ph2_mean, ph2_lss))
    assert jnp.allclose(out, ref, rtol=1e-5, atol=1e-5), (out, ref)

    # also check the n_h1 == 0 path (only z term)
    out_z = jax.block_until_ready(
        jax.jit(functools.partial(latent_loss, 0, 0))(
            z_mean, z_lss, pz_mean, pz_lss))
    assert jnp.allclose(out_z, _kl_term_ref(z_mean, z_lss, pz_mean, pz_lss),
                        rtol=1e-5, atol=1e-5)

    print("KERNEL_OK")
</pallas_src>

<mosaic_0001>
module attributes {stable_mosaic.version = 11 : i64} {
  func.func @_latent_loss_kernel(%arg0: i32, %arg1: memref<8x128xf32, #tpu.memory_space<vmem>>, %arg2: memref<8x128xf32, #tpu.memory_space<vmem>>, %arg3: memref<8x128xf32, #tpu.memory_space<vmem>>, %arg4: memref<8x128xf32, #tpu.memory_space<vmem>>, %arg5: memref<1x1xf32, #tpu.memory_space<smem>>) attributes {dimension_semantics = [#tpu.dimension_semantics<arbitrary>], iteration_bounds = array<i64: 1>, scalar_prefetch = 0 : i64, scratch_operands = 0 : i64, tpu.core_type = #tpu.core_type<tc>, window_params = [{transform_indices = @transform_0, window_bounds = array<i64: 8, 128>}, {transform_indices = @transform_1, window_bounds = array<i64: 8, 128>}, {transform_indices = @transform_2, window_bounds = array<i64: 8, 128>}, {transform_indices = @transform_3, window_bounds = array<i64: 8, 128>}, {transform_indices = @transform_4, window_bounds = array<i64: 1, 1>}]} {
    %c0_i32 = arith.constant 0 : i32
    %0 = arith.cmpi eq, %arg0, %c0_i32 : i32
    %1 = arith.extui %0 : i1 to i32
    %c0_i32_0 = arith.constant 0 : i32
    %2 = arith.cmpi ne, %1, %c0_i32_0 : i32
    scf.if %2 {
      %cst_15 = arith.constant 0.000000e+00 : f32
      %c0_16 = arith.constant 0 : index
      %c0_17 = arith.constant 0 : index
      %29 = memref.load %arg5[%c0_16, %c0_17] : memref<1x1xf32, #tpu.memory_space<smem>>
      memref.store %cst_15, %arg5[%c0_16, %c0_17] : memref<1x1xf32, #tpu.memory_space<smem>>
    } else {
    }
    %c0 = arith.constant 0 : index
    %c0_1 = arith.constant 0 : index
    %3 = vector.load %arg1[%c0, %c0_1] : memref<8x128xf32, #tpu.memory_space<vmem>>, vector<8x128xf32>
    %c0_2 = arith.constant 0 : index
    %c0_3 = arith.constant 0 : index
    %4 = vector.load %arg2[%c0_2, %c0_3] : memref<8x128xf32, #tpu.memory_space<vmem>>, vector<8x128xf32>
    %c0_4 = arith.constant 0 : index
    %c0_5 = arith.constant 0 : index
    %5 = vector.load %arg3[%c0_4, %c0_5] : memref<8x128xf32, #tpu.memory_space<vmem>>, vector<8x128xf32>
    %c0_6 = arith.constant 0 : index
    %c0_7 = arith.constant 0 : index
    %6 = vector.load %arg4[%c0_6, %c0_7] : memref<8x128xf32, #tpu.memory_space<vmem>>, vector<8x128xf32>
    %7 = arith.subf %3, %5 : vector<8x128xf32>
    %8 = math.log %6 : vector<8x128xf32>
    %cst = arith.constant 2.000000e+00 : f32
    %9 = vector.broadcast %cst : f32 to vector<8x128xf32>
    %10 = arith.mulf %9, %8 : vector<8x128xf32>
    %11 = arith.mulf %6, %6 : vector<8x128xf32>
    %12 = tpu.reciprocal %11 : vector<8x128xf32> -> vector<8x128xf32>
    %cst_8 = arith.constant 1.000000e+00 : f32
    %13 = vector.broadcast %cst_8 : f32 to vector<8x128xf32>
    %14 = arith.addf %13, %4 : vector<8x128xf32>
    %15 = arith.subf %14, %10 : vector<8x128xf32>
    %16 = arith.mulf %7, %7 : vector<8x128xf32>
    %17 = math.exp %4 : vector<8x128xf32>
    %18 = arith.addf %16, %17 : vector<8x128xf32>
    %19 = arith.mulf %18, %12 : vector<8x128xf32>
    %20 = arith.subf %15, %19 : vector<8x128xf32>
    %c0_9 = arith.constant 0 : index
    %c0_10 = arith.constant 0 : index
    %21 = memref.load %arg5[%c0_9, %c0_10] : memref<1x1xf32, #tpu.memory_space<smem>>
    %22 = vector.shape_cast %20 : vector<8x128xf32> to vector<1x8x128xf32>
    %cst_11 = arith.constant dense<0.000000e+00> : vector<1xf32>
    %23 = vector.multi_reduction <add>, %22, %cst_11 [1, 2] : vector<1x8x128xf32> to vector<1xf32>
    %24 = vector.shape_cast %23 : vector<1xf32> to vector<1x1x1xf32>
    %25 = vector.extract %24[0, 0, 0] : f32 from vector<1x1x1xf32>
    %cst_12 = arith.constant -5.000000e-01 : f32
    %26 = arith.mulf %cst_12, %25 : f32
    %27 = arith.addf %21, %26 : f32
    %c0_13 = arith.constant 0 : index
    %c0_14 = arith.constant 0 : index
    %28 = memref.load %arg5[%c0_13, %c0_14] : memref<1x1xf32, #tpu.memory_space<smem>>
    memref.store %27, %arg5[%c0_13, %c0_14] : memref<1x1xf32, #tpu.memory_space<smem>>
    return
  }
  func.func @transform_0(%arg0: i32) -> (i32, i32) {
    %c0_i32 = arith.constant 0 : i32
    %c0_i32_0 = arith.constant 0 : i32
    return %arg0, %c0_i32 : i32, i32
  }
  func.func @transform_1(%arg0: i32) -> (i32, i32) {
    %c0_i32 = arith.constant 0 : i32
    %c0_i32_0 = arith.constant 0 : i32
    return %arg0, %c0_i32 : i32, i32
  }
  func.func @transform_2(%arg0: i32) -> (i32, i32) {
    %c0_i32 = arith.constant 0 : i32
    %c0_i32_0 = arith.constant 0 : i32
    return %arg0, %c0_i32 : i32, i32
  }
  func.func @transform_3(%arg0: i32) -> (i32, i32) {
    %c0_i32 = arith.constant 0 : i32
    %c0_i32_0 = arith.constant 0 : i32
    return %arg0, %c0_i32 : i32, i32
  }
  func.func @transform_4(%arg0: i32) -> (i32, i32) {
    %c0_i32 = arith.constant 0 : i32
    %c0_i32_0 = arith.constant 0 : i32
    %c0_i32_1 = arith.constant 0 : i32
    return %c0_i32, %c0_i32_0 : i32, i32
  }
}

</mosaic_0001>

<bundles_post_ra>
// kernel: latent_loss.1
= control target key start
LH: loop header
LB: loop body
LE: loop exit
PB: predicated region body
PF: predicated region fallthrough
CT: control target
= control target key end

     0   :  { %s149_s0 = inlined_call_operand.vmem [shape: f32[8,128], index: 0, kind: input, shape index: {}]   ;;  %s150_s1 = inlined_call_operand.vmem [shape: f32[8,128], index: 1, kind: input, shape index: {}]   ;;  %s151_s2 = inlined_call_operand.vmem [shape: f32[8,128], index: 2, kind: input, shape index: {}]   ;;  %s152_s3 = inlined_call_operand.vmem [shape: f32[8,128], index: 3, kind: input, shape index: {}]   ;;  %s153_s4 = inlined_call_operand.hbm [shape: f32[1,1], index: 4, kind: output, shape index: {}]  }
   0x1   :  { %v25_v0 = vld [vmem:[%s150_s1] sm:$0xff] }
   0x2   :  { %v27_v1 = vld [vmem:[%s152_s3] sm:$0xff] }
   0x3   :  { %9 = vsyncpa [#allocation3], 0  ;;  %88 = vlog2.f32 %v27_v1  ;;  %v32_v2 = vmul.f32 %v27_v1, %v27_v1  ;;  %v50_v3 = vmul.f32 1.442695, %v25_v0  ;;  %v24_v4 = vld [vmem:[%s149_s0] sm:$0xff]  ;;  %v47_v18 = vadd.f32 1.0, %v25_v0 }
   0x4   :  { %v26_v5 = vld [vmem:[%s151_s2] sm:$0xff]  ;;  %s74_s2 = sshll.u32 %s153_s4, 4  ;;  %s108_s24 = smov [#allocation2]   ;;  %s75_s2 = int_to_ptr.hbm [resolvable:$true] %s74_s2 }
   0x5   :  { %90 = vrcp.f32 %v32_v2  ;;  %v28_v7 = vsub.f32 %v24_v4, %v26_v5  ;;  %v44_v11 = vand.u32 2147483648, %v32_v2  ;;  %vm38_vm0 = vweird.f32 %v32_v2 }
   0x6   :  { %92 = vpow2.f32 %v50_v3  ;;  %v42_v14 = vand.u32 2147483647, %v32_v2 }
   0x7   :  { %v49_v12 = vmul.f32 %v28_v7, %v28_v7  ;;  %v45_v19 = vor.u32 1.1754944e-38, %v44_v11 }
   0x8   :  { %vm43_vm3 = vcmp.eq.f32.partialorder %v42_v14, 8.507059e+37 }
   0x9   :  { %v89_v6 = vpop.eup %88 }
   0xa   :  { %v30_v9 = vmul.f32 0.6931472, %v89_v6 }
   0xb   :  { %v91_v8 = vpop.eup %90 }
   0xc   :  { %v34_v10 = vmul.f32 %v91_v8, %v32_v2  ;;  %vm39_vm1 = vweird.f32 %v91_v8  ;;  %v93_v15 = vpop.eup %92  ;;  %v31_v16 = vmul.f32 2.0, %v30_v9 }
   0xd   :  { %vm40_vm2 = vmor %vm38_vm0, %vm39_vm1  ;;  %v52_v21 = vadd.f32 %v93_v15, %v49_v12 }
   0xe   :  { %v35_v13 = vsub.f32 1.0, %v34_v10  ;;  %v48_v23 = vsub.f32 %v47_v18, %v31_v16 }
  0x10   :  { %v36_v17 = vmul.f32 %v91_v8, %v35_v13 }
  0x12   :  { %v37_v20 = vadd.f32 %v91_v8, %v36_v17 }
  0x14   :  { %v41_v22 = vsel %vm40_vm2, %v91_v8, %v37_v20 }
  0x15   :  { %v46_v24 = vsel %vm43_vm3, %v45_v19, %v41_v22 }
  0x16   :  { %v53_v25 = vmul.f32 %v52_v21, %v46_v24 }
  0x18   :  { %v54_v26 = vsub.f32 %v48_v23, %v53_v25 }
  0x1a   :  { %56 = vadd.xlane.f32.xlu0 %v54_v26 }
  0x8d   :  { %v57_v27 = vpop.xlane.xlu0 %56 }
  0x8e   :  { %v58_v28 = vrot.slane %v57_v27, 4 }
  0x90   :  { %v59_v29 = vadd.f32 %v58_v28, %v57_v27 }
  0x92   :  { %v60_v30 = vrot.slane %v59_v29, 2 }
  0x94   :  { %v61_v31 = vadd.f32 %v60_v30, %v59_v29 }
  0x96   :  { %v62_v32 = vrot.slane %v61_v31, 1 }
  0x98   :  { %v63_v33 = vadd.f32 %v62_v32, %v61_v31 }
  0x9a   :  { %84 = vpush %v63_v33 }
  0xcb   :  { %s85_s3 = spop %84 }
  0xcc   :  { %s65_s23 = smul.f32 -0.5, %s85_s3 }
  0xce   :  { %68 = sst [smem:[#allocation2]] %s65_s23 }
  0xcf   :  { %77 = dma.smem_to_hbm %s108_s24, 16, %s75_s2, [#allocation3]  }
  0xd0   :  { %106 = dma.done.wait [#allocation3], 16  }
  0xd1   :  { %107 = vsyncadd [#allocation3], 4294967280 }
  0xd2   :  { %82 = sfence }
  0xd3   :  { %83 = vsyncpa [#allocation3], 1 }

</bundles_post_ra>
